<compile_context>
chip_gen: v6e
topology: v6e:2x2x1
jax: 0.10.0
libtpu: 0.0.40
codegen_flags: <defaults>
</compile_context>

<pallas_src>
import functools

import jax
import jax.numpy as jnp
from jax.experimental import pallas as pl
from jax.experimental.pallas import tpu as pltpu

INPUT_SIZE = 784
HIDDEN_SIZE = 500
NUM_CLASSES = 10

# Lane-aligned padded dims (multiples of 128).
K_PAD = 896   # 784 -> 896
H_PAD = 512   # 500 -> 512
N_PAD = 128   # 10  -> 128

DEFAULT_TILE_B = 256  # batch tile; multiple of 8, comfortably within v7x's 32 MiB scoped VMEM


def _round_up(x, m):
    return ((x + m - 1) // m) * m


def mlp_kernel(x_ref, w1_ref, b1_ref, w2_ref, out_ref):
    # fc1: (TILE_B, K_PAD) @ (K_PAD, H_PAD), f32 accumulation on the MXU.
    pre = jnp.dot(x_ref[...], w1_ref[...], preferred_element_type=jnp.float32)
    # Bias add + ReLU in f32 (cheap on all chips; avoids bf16 VPU issues on v5e).
    hidden = jnp.maximum(pre + b1_ref[...], 0.0)
    # fc2 (no bias): downcast hidden to the weight dtype for full-rate bf16 MXU.
    hidden = hidden.astype(w2_ref.dtype)
    out_ref[...] = jnp.dot(hidden, w2_ref[...],
                           preferred_element_type=jnp.float32).astype(out_ref.dtype)


@functools.partial(jax.jit, static_argnames=("tile_b", "compute_dtype"))
def neural_net_forward(x, w1, b1, w2, *, tile_b=None, compute_dtype=jnp.bfloat16):
    """x: (B, 784); w1: (784, 500); b1: (500,); w2: (500, 10). Returns (B, 10) f32.

    Weights are stored as (in_features, out_features) (transpose of PyTorch Linear.weight),
    so the math is x @ W1 + b1 -> relu -> @ W2, identical to NeuralNet.forward.
    """
    B = x.shape[0]
    if tile_b is None:
        tile_b = min(DEFAULT_TILE_B, _round_up(max(B, 1), 8))
    B_pad = _round_up(B, tile_b)

    # Zero-pad everything to lane/MXU-friendly shapes. Padded weight/bias/x regions are
    # zero, so relu(0 + 0) = 0 contributes nothing; padded rows/cols are sliced off below.
    x_p = jnp.zeros((B_pad, K_PAD), compute_dtype).at[:B, :INPUT_SIZE].set(
        x.astype(compute_dtype))
    w1_p = jnp.zeros((K_PAD, H_PAD), compute_dtype).at[:INPUT_SIZE, :HIDDEN_SIZE].set(
        w1.astype(compute_dtype))
    b1_p = jnp.zeros((1, H_PAD), jnp.float32).at[:, :HIDDEN_SIZE].set(
        b1.astype(jnp.float32))
    w2_p = jnp.zeros((H_PAD, N_PAD), compute_dtype).at[:HIDDEN_SIZE, :NUM_CLASSES].set(
        w2.astype(compute_dtype))

    grid = (B_pad // tile_b,)

    itemsize = jnp.dtype(compute_dtype).itemsize
    flops = 2 * B_pad * (K_PAD * H_PAD + H_PAD * N_PAD)
    bytes_accessed = (B_pad * K_PAD * itemsize          # x in
                      + K_PAD * H_PAD * itemsize        # w1 (loaded once)
                      + H_PAD * 4                       # b1
                      + H_PAD * N_PAD * itemsize        # w2
                      + B_pad * N_PAD * 4)              # out

    out_pad = pl.pallas_call(
        mlp_kernel,
        out_shape=jax.ShapeDtypeStruct((B_pad, N_PAD), jnp.float32),
        grid=grid,
        in_specs=[
            pl.BlockSpec((tile_b, K_PAD), lambda i: (i, 0)),   # x: streamed per batch tile
            pl.BlockSpec((K_PAD, H_PAD), lambda i: (0, 0)),    # w1: VMEM-resident
            pl.BlockSpec((1, H_PAD), lambda i: (0, 0)),        # b1: VMEM-resident
            pl.BlockSpec((H_PAD, N_PAD), lambda i: (0, 0)),    # w2: VMEM-resident
        ],
        out_specs=pl.BlockSpec((tile_b, N_PAD), lambda i: (i, 0)),
        compiler_params=pltpu.CompilerParams(
            dimension_semantics=("parallel",)),
        cost_estimate=pl.CostEstimate(
            flops=flops, transcendentals=0, bytes_accessed=bytes_accessed),
    )(x_p, w1_p, b1_p, w2_p)

    # Strip batch padding and the lane padding of the class dim.
    return out_pad[:B, :NUM_CLASSES]


def init_params(key):
    """Deterministic init mirroring PyTorch Linear default (uniform +/- 1/sqrt(fan_in))."""
    k1, k2, k3 = jax.random.split(key, 3)
    bound1 = 1.0 / (INPUT_SIZE ** 0.5)
    bound2 = 1.0 / (HIDDEN_SIZE ** 0.5)
    # Stored as (in, out) so the kernel does x @ W directly.
    w1 = jax.random.uniform(k1, (INPUT_SIZE, HIDDEN_SIZE), jnp.float32,
                            minval=-bound1, maxval=bound1)
    b1 = jax.random.uniform(k2, (HIDDEN_SIZE,), jnp.float32,
                            minval=-bound1, maxval=bound1)
    w2 = jax.random.uniform(k3, (HIDDEN_SIZE, NUM_CLASSES), jnp.float32,
                            minval=-bound2, maxval=bound2)
    return w1, b1, w2


# TODO(synk): the PyTorch module's input_features / hidden_features caching
# (get_input_features / get_hidden_features) is stateful bookkeeping, not compute;
# it has no kernel-side equivalent and is intentionally not reproduced.


if __name__ == "__main__":
    key = jax.random.PRNGKey(0)
    kx, kp = jax.random.split(key)

    batch = 8
    x = jax.random.normal(kx, (batch, INPUT_SIZE), dtype=jnp.float32)
    w1, b1, w2 = init_params(kp)

    out = neural_net_forward(x, w1, b1, w2)
    out = jax.block_until_ready(out)
    assert out.shape == (batch, NUM_CLASSES)

    # Reference with the same bf16 rounding the kernel applies (f32 accumulation).
    xb = x.astype(jnp.bfloat16).astype(jnp.float32)
    w1b = w1.astype(jnp.bfloat16).astype(jnp.float32)
    w2b = w2.astype(jnp.bfloat16).astype(jnp.float32)
    hidden_ref = jnp.maximum(xb @ w1b + b1, 0.0).astype(jnp.bfloat16).astype(jnp.float32)
    ref = hidden_ref @ w2b
    assert jnp.allclose(out, ref, atol=2e-2, rtol=2e-2), \
        float(jnp.max(jnp.abs(out - ref)))

    # Looser sanity check against the full-precision f32 reference (same PyTorch math).
    ref_f32 = jnp.maximum(x @ w1 + b1, 0.0) @ w2
    assert jnp.allclose(out, ref_f32, atol=5e-2, rtol=5e-2), \
        float(jnp.max(jnp.abs(out - ref_f32)))

    print("KERNEL_OK")
</pallas_src>

<mosaic_0001>
module attributes {stable_mosaic.version = 11 : i64} {
  func.func @mlp_kernel(%arg0: i32, %arg1: memref<8x896xbf16, #tpu.memory_space<vmem>>, %arg2: memref<896x512xbf16, #tpu.memory_space<vmem>>, %arg3: memref<1x512xf32, #tpu.memory_space<vmem>>, %arg4: memref<512x128xbf16, #tpu.memory_space<vmem>>, %arg5: memref<8x128xf32, #tpu.memory_space<vmem>>) attributes {dimension_semantics = [#tpu.dimension_semantics<parallel>], iteration_bounds = array<i64: 1>, scalar_prefetch = 0 : i64, scratch_operands = 0 : i64, tpu.core_type = #tpu.core_type<tc>, window_params = [{transform_indices = @transform_0, window_bounds = array<i64: 8, 896>}, {pipeline_mode = #tpu.pipeline_mode<synchronous>, transform_indices = @transform_1, window_bounds = array<i64: 896, 512>}, {pipeline_mode = #tpu.pipeline_mode<synchronous>, transform_indices = @transform_2, window_bounds = array<i64: 1, 512>}, {pipeline_mode = #tpu.pipeline_mode<synchronous>, transform_indices = @transform_3, window_bounds = array<i64: 512, 128>}, {transform_indices = @transform_4, window_bounds = array<i64: 8, 128>}]} {
    %c0 = arith.constant 0 : index
    %c0_0 = arith.constant 0 : index
    %0 = vector.load %arg1[%c0, %c0_0] : memref<8x896xbf16, #tpu.memory_space<vmem>>, vector<8x896xbf16>
    %c0_1 = arith.constant 0 : index
    %c0_2 = arith.constant 0 : index
    %1 = vector.load %arg2[%c0_1, %c0_2] : memref<896x512xbf16, #tpu.memory_space<vmem>>, vector<896x512xbf16>
    %cst = arith.constant dense<0.000000e+00> : vector<8x512xf32>
    %2 = tpu.matmul %0, %1, %cst {dimension_numbers = #tpu.dot_dimension_numbers<[1], [0], [0], [1], [0, 0, 1, 1], [], []>} : vector<8x896xbf16>, vector<896x512xbf16>, vector<8x512xf32> -> vector<8x512xf32>
    %c0_3 = arith.constant 0 : index
    %c0_4 = arith.constant 0 : index
    %3 = vector.load %arg3[%c0_3, %c0_4] : memref<1x512xf32, #tpu.memory_space<vmem>>, vector<1x512xf32>
    %4 = vector.broadcast %3 : vector<1x512xf32> to vector<8x512xf32>
    %5 = arith.addf %2, %4 : vector<8x512xf32>
    %cst_5 = arith.constant 0.000000e+00 : f32
    %6 = vector.broadcast %cst_5 : f32 to vector<8x512xf32>
    %7 = arith.maximumf %5, %6 : vector<8x512xf32>
    %8 = arith.truncf %7 : vector<8x512xf32> to vector<8x512xbf16>
    %c0_6 = arith.constant 0 : index
    %c0_7 = arith.constant 0 : index
    %9 = vector.load %arg4[%c0_6, %c0_7] : memref<512x128xbf16, #tpu.memory_space<vmem>>, vector<512x128xbf16>
    %cst_8 = arith.constant dense<0.000000e+00> : vector<8x128xf32>
    %10 = tpu.matmul %8, %9, %cst_8 {dimension_numbers = #tpu.dot_dimension_numbers<[1], [0], [0], [1], [0, 0, 1, 1], [], []>} : vector<8x512xbf16>, vector<512x128xbf16>, vector<8x128xf32> -> vector<8x128xf32>
    %c0_9 = arith.constant 0 : index
    %c0_10 = arith.constant 0 : index
    %11 = vector.load %arg5[%c0_9, %c0_10] : memref<8x128xf32, #tpu.memory_space<vmem>>, vector<8x128xf32>
    tpu.vector_store %arg5[%c0_9, %c0_10], %10 {strides = array<i32>} : memref<8x128xf32, #tpu.memory_space<vmem>>, vector<8x128xf32>,
    return
  }
  func.func @transform_0(%arg0: i32) -> (i32, i32) {
    %c0_i32 = arith.constant 0 : i32
    %c0_i32_0 = arith.constant 0 : i32
    return %arg0, %c0_i32 : i32, i32
  }
  func.func @transform_1(%arg0: i32) -> (i32, i32) {
    %c0_i32 = arith.constant 0 : i32
    %c0_i32_0 = arith.constant 0 : i32
    %c0_i32_1 = arith.constant 0 : i32
    return %c0_i32, %c0_i32_0 : i32, i32
  }
  func.func @transform_2(%arg0: i32) -> (i32, i32) {
    %c0_i32 = arith.constant 0 : i32
    %c0_i32_0 = arith.constant 0 : i32
    %c0_i32_1 = arith.constant 0 : i32
    return %c0_i32, %c0_i32_0 : i32, i32
  }
  func.func @transform_3(%arg0: i32) -> (i32, i32) {
    %c0_i32 = arith.constant 0 : i32
    %c0_i32_0 = arith.constant 0 : i32
    %c0_i32_1 = arith.constant 0 : i32
    return %c0_i32, %c0_i32_0 : i32, i32
  }
  func.func @transform_4(%arg0: i32) -> (i32, i32) {
    %c0_i32 = arith.constant 0 : i32
    %c0_i32_0 = arith.constant 0 : i32
    return %arg0, %c0_i32 : i32, i32
  }
}

</mosaic_0001>

<bundles_post_ra>
// kernel: neural_net_forward.1
= control target key start
LH: loop header
LB: loop body
LE: loop exit
PB: predicated region body
PF: predicated region fallthrough
CT: control target
= control target key end

     0   :  { %s3656_s0 = inlined_call_operand.vmem [shape: bf16[8,896], index: 0, kind: input, shape index: {}]   ;;  %s3657_s1 = inlined_call_operand.vmem [shape: bf16[896,512], index: 1, kind: input, shape index: {}]   ;;  %s3658_s2 = inlined_call_operand.vmem [shape: f32[1,512], index: 2, kind: input, shape index: {}]   ;;  %s3659_s3 = inlined_call_operand.vmem [shape: bf16[512,128], index: 3, kind: input, shape index: {}]   ;;  %s3660_s4 = inlined_call_operand.hbm [shape: f32[8,128], index: 4, kind: output, shape index: {}]  }
   0x1   :  { %v2410_v0 = vld [vmem:[%s3657_s1 + $0xe4] ss:$16 sps:$4 sm:$0xff]   ;;  %v2414_v2 = vld [vmem:[%s3657_s1 + $0xe0] ss:$16 sps:$4 sm:$0xff]   ;;  %v20_v48 = vld [vmem:[%s3656_s0 + $0x8] sm:$0xff] }
   0x2   :  { %v2412_v1 = vld [vmem:[%s3657_s1 + $0x2e4] ss:$16 sps:$4 sm:$0xff]   ;;  %1414 = vmatprep.subr.bf16.mxu0 %v2410_v0  ;;  %v2415_v3 = vld [vmem:[%s3657_s1 + $0x2e0] ss:$16 sps:$4 sm:$0xff]   ;;  %v2986_v51 = vcombine.high %v20_v48, %v20_v48 }
   0x3   :  { %1455 = vmatprep.subr.bf16.mxu1 %v2412_v1  ;;  %v2416_v4 = vld [vmem:[%s3657_s1 + $0xc4] ss:$16 sps:$4 sm:$0xff]   ;;  %1415 = vmatpush1.bf16.msra.mxu0 %v2414_v2  ;;  %v2420_v6 = vld [vmem:[%s3657_s1 + $0xc0] ss:$16 sps:$4 sm:$0xff]  }
   0x4   :  { %1456 = vmatpush1.bf16.msra.mxu1 %v2415_v3  ;;  %v2418_v5 = vld [vmem:[%s3657_s1 + $0x2c4] ss:$16 sps:$4 sm:$0xff]   ;;  %1416 = vmatprep.subr.bf16.mxu0 %v2416_v4  ;;  %v2421_v7 = vld [vmem:[%s3657_s1 + $0x2c0] ss:$16 sps:$4 sm:$0xff]  }
   0x5   :  { %1457 = vmatprep.subr.bf16.mxu1 %v2418_v5  ;;  %v2422_v8 = vld [vmem:[%s3657_s1 + $0xa4] ss:$16 sps:$4 sm:$0xff]   ;;  %v2426_v10 = vld [vmem:[%s3657_s1 + $0xa0] ss:$16 sps:$4 sm:$0xff]   ;;  %1487 = vmatprep.mubr.bf16.mxu1 %v2986_v51 }
   0x6   :  { %v2424_v9 = vld [vmem:[%s3657_s1 + $0x2a4] ss:$16 sps:$4 sm:$0xff]   ;;  %v2427_v11 = vld [vmem:[%s3657_s1 + $0x2a0] ss:$16 sps:$4 sm:$0xff]  }
   0x7   :  { %1417 = vmatpush1.bf16.msra.mxu0 %v2420_v6  ;;  %v2428_v12 = vld [vmem:[%s3657_s1 + $0x84] ss:$16 sps:$4 sm:$0xff]   ;;  %v2432_v14 = vld [vmem:[%s3657_s1 + $0x80] ss:$16 sps:$4 sm:$0xff]  }
   0x8   :  { %1458 = vmatpush1.bf16.msra.mxu1 %v2421_v7  ;;  %1418 = vmatprep.subr.bf16.mxu0 %v2422_v8  ;;  %v2430_v13 = vld [vmem:[%s3657_s1 + $0x284] ss:$16 sps:$4 sm:$0xff]   ;;  %v2433_v15 = vld [vmem:[%s3657_s1 + $0x280] ss:$16 sps:$4 sm:$0xff]   ;;  %v3046_v7 = vcombine.low %v20_v48, %v20_v48  ;;  %v2570_v48 = vld [vmem:[%s3657_s1 + $0xcc] ss:$16 sps:$4 sm:$0xff]  }
   0x9   :  { %1459 = vmatprep.subr.bf16.mxu1 %v2424_v9  ;;  %v2434_v16 = vld [vmem:[%s3657_s1 + $0x64] ss:$16 sps:$4 sm:$0xff]   ;;  %v2438_v18 = vld [vmem:[%s3657_s1 + $0x60] ss:$16 sps:$4 sm:$0xff]  }
   0xa   :  { %v2436_v17 = vld [vmem:[%s3657_s1 + $0x264] ss:$16 sps:$4 sm:$0xff]   ;;  %v2439_v19 = vld [vmem:[%s3657_s1 + $0x260] ss:$16 sps:$4 sm:$0xff]  }
   0xb   :  { %1419 = vmatpush1.bf16.msra.mxu0 %v2426_v10  ;;  %v2440_v20 = vld [vmem:[%s3657_s1 + $0x44] ss:$16 sps:$4 sm:$0xff]   ;;  %v2444_v22 = vld [vmem:[%s3657_s1 + $0x40] ss:$16 sps:$4 sm:$0xff]  }
   0xc   :  { %1460 = vmatpush1.bf16.msra.mxu1 %v2427_v11  ;;  %1420 = vmatprep.subr.bf16.mxu0 %v2428_v12  ;;  %v2442_v21 = vld [vmem:[%s3657_s1 + $0x244] ss:$16 sps:$4 sm:$0xff]   ;;  %v2445_v23 = vld [vmem:[%s3657_s1 + $0x240] ss:$16 sps:$4 sm:$0xff]  }
   0xd   :  { %1461 = vmatprep.subr.bf16.mxu1 %v2430_v13  ;;  %v2446_v24 = vld [vmem:[%s3657_s1 + $0x24] ss:$16 sps:$4 sm:$0xff]   ;;  %v2450_v26 = vld [vmem:[%s3657_s1 + $0x20] ss:$16 sps:$4 sm:$0xff]  }
   0xe   :  { %v2448_v25 = vld [vmem:[%s3657_s1 + $0x224] ss:$16 sps:$4 sm:$0xff]   ;;  %v2451_v27 = vld [vmem:[%s3657_s1 + $0x220] ss:$16 sps:$4 sm:$0xff]  }
   0xf   :  { %1421 = vmatpush1.bf16.msra.mxu0 %v2432_v14  ;;  %v2452_v28 = vld [vmem:[%s3657_s1 + $0x4] ss:$16 sps:$4 sm:$0xff]   ;;  %v2456_v30 = vld [vmem:[%s3657_s1] ss:$16 sps:$4 sm:$0xff]  }
  0x10   :  { %1462 = vmatpush1.bf16.msra.mxu1 %v2433_v15  ;;  %1422 = vmatprep.subr.bf16.mxu0 %v2434_v16  ;;  %v2454_v29 = vld [vmem:[%s3657_s1 + $0x204] ss:$16 sps:$4 sm:$0xff]   ;;  %v2457_v31 = vld [vmem:[%s3657_s1 + $0x200] ss:$16 sps:$4 sm:$0xff]   ;;  %v2807_v16 = vmov 0  }
  0x11   :  { %1463 = vmatprep.subr.bf16.mxu1 %v2436_v17  ;;  %v2458_v32 = vld [vmem:[%s3657_s1 + $0x1e4] ss:$16 sps:$4 sm:$0xff]   ;;  %v2462_v34 = vld [vmem:[%s3657_s1 + $0x1e0] ss:$16 sps:$4 sm:$0xff]  }
  0x12   :  { %v2460_v33 = vld [vmem:[%s3657_s1 + $0x3e4] ss:$16 sps:$4 sm:$0xff]   ;;  %v2463_v35 = vld [vmem:[%s3657_s1 + $0x3e0] ss:$16 sps:$4 sm:$0xff]  }
  0x13   :  { %1423 = vmatpush1.bf16.msra.mxu0 %v2438_v18  ;;  %v2464_v36 = vld [vmem:[%s3657_s1 + $0x1c4] ss:$16 sps:$4 sm:$0xff]   ;;  %v2468_v38 = vld [vmem:[%s3657_s1 + $0x1c0] ss:$16 sps:$4 sm:$0xff]  }
  0x14   :  { %1464 = vmatpush1.bf16.msra.mxu1 %v2439_v19  ;;  %1424 = vmatprep.subr.bf16.mxu0 %v2440_v20  ;;  %v2466_v37 = vld [vmem:[%s3657_s1 + $0x3c4] ss:$16 sps:$4 sm:$0xff]   ;;  %v2469_v39 = vld [vmem:[%s3657_s1 + $0x3c0] ss:$16 sps:$4 sm:$0xff]  }
  0x15   :  { %1465 = vmatprep.subr.bf16.mxu1 %v2442_v21  ;;  %v2470_v40 = vld [vmem:[%s3657_s1 + $0x1a4] ss:$16 sps:$4 sm:$0xff]   ;;  %v2474_v42 = vld [vmem:[%s3657_s1 + $0x1a0] ss:$16 sps:$4 sm:$0xff]  }
  0x16   :  { %v2472_v41 = vld [vmem:[%s3657_s1 + $0x3a4] ss:$16 sps:$4 sm:$0xff]   ;;  %v2475_v43 = vld [vmem:[%s3657_s1 + $0x3a0] ss:$16 sps:$4 sm:$0xff]  }
  0x17   :  { %1425 = vmatpush1.bf16.msra.mxu0 %v2444_v22  ;;  %v2476_v44 = vld [vmem:[%s3657_s1 + $0x184] ss:$16 sps:$4 sm:$0xff]   ;;  %v2480_v49 = vld [vmem:[%s3657_s1 + $0x180] ss:$16 sps:$4 sm:$0xff]  }
  0x18   :  { %1466 = vmatpush1.bf16.msra.mxu1 %v2445_v23  ;;  %1426 = vmatprep.subr.bf16.mxu0 %v2446_v24  ;;  %v2478_v45 = vld [vmem:[%s3657_s1 + $0x384] ss:$16 sps:$4 sm:$0xff]   ;;  %v2481_v50 = vld [vmem:[%s3657_s1 + $0x380] ss:$16 sps:$4 sm:$0xff]  }
  0x19   :  { %1467 = vmatprep.subr.bf16.mxu1 %v2448_v25  ;;  %v19_v46 = vld [vmem:[%s3656_s0] sm:$0xff] }
  0x1a   :  { %v2975_v47 = vcombine.high %v19_v46, %v19_v46  ;;  %v2482_v52 = vld [vmem:[%s3657_s1 + $0x164] ss:$16 sps:$4 sm:$0xff]   ;;  %v2486_v54 = vld [vmem:[%s3657_s1 + $0x160] ss:$16 sps:$4 sm:$0xff]   ;;  %v3044_v6 = vcombine.low %v19_v46, %v19_v46 }
  0x1b   :  { %1427 = vmatpush1.bf16.msra.mxu0 %v2450_v26  ;;  %v2484_v53 = vld [vmem:[%s3657_s1 + $0x364] ss:$16 sps:$4 sm:$0xff]   ;;  %v2487_v55 = vld [vmem:[%s3657_s1 + $0x360] ss:$16 sps:$4 sm:$0xff]  }
  0x1c   :  { %1468 = vmatpush1.bf16.msra.mxu1 %v2451_v27  ;;  %1428 = vmatprep.subr.bf16.mxu0 %v2452_v28  ;;  %v2488_v56 = vld [vmem:[%s3657_s1 + $0x144] ss:$16 sps:$4 sm:$0xff]   ;;  %v2492_v58 = vld [vmem:[%s3657_s1 + $0x140] ss:$16 sps:$4 sm:$0xff]  }
  0x1d   :  { %1469 = vmatprep.subr.bf16.mxu1 %v2454_v29  ;;  %1446 = vmatprep.mubr.bf16.mxu0 %v2975_v47  ;;  %v2490_v57 = vld [vmem:[%s3657_s1 + $0x344] ss:$16 sps:$4 sm:$0xff]   ;;  %v2493_v59 = vld [vmem:[%s3657_s1 + $0x340] ss:$16 sps:$4 sm:$0xff]  }
  0x1e   :  { %v2494_v60 = vld [vmem:[%s3657_s1 + $0x124] ss:$16 sps:$4 sm:$0xff]   ;;  %v2498_v62 = vld [vmem:[%s3657_s1 + $0x120] ss:$16 sps:$4 sm:$0xff]  }
  0x1f   :  { %1429 = vmatpush1.bf16.msra.mxu0 %v2456_v30  ;;  %v2496_v61 = vld [vmem:[%s3657_s1 + $0x324] ss:$16 sps:$4 sm:$0xff]   ;;  %v2499_v63 = vld [vmem:[%s3657_s1 + $0x320] ss:$16 sps:$4 sm:$0xff]  }
  0x20   :  { %1470 = vmatpush1.bf16.msra.mxu1 %v2457_v31  ;;  %1430 = vmatprep.subr.bf16.mxu0 %v2458_v32  ;;  %v2500_v0 = vld [vmem:[%s3657_s1 + $0x104] ss:$16 sps:$4 sm:$0xff]   ;;  %v2504_v2 = vld [vmem:[%s3657_s1 + $0x100] ss:$16 sps:$4 sm:$0xff]  }
  0x21   :  { %1471 = vmatprep.subr.bf16.mxu1 %v2460_v33  ;;  %v2502_v1 = vld [vmem:[%s3657_s1 + $0x304] ss:$16 sps:$4 sm:$0xff]   ;;  %v2505_v3 = vld [vmem:[%s3657_s1 + $0x300] ss:$16 sps:$4 sm:$0xff]  }
  0x22   :  { %v2512_v4 = vld [vmem:[%s3657_s1 + $0x4e4] ss:$16 sps:$4 sm:$0xff]   ;;  %v2510_v8 = vld [vmem:[%s3657_s1 + $0x4e0] ss:$16 sps:$4 sm:$0xff]  }
  0x23   :  { %1431 = vmatpush2.bf16.msra.mxu0 %v2462_v34  ;;  %v2515_v5 = vld [vmem:[%s3657_s1 + $0x6e4] ss:$16 sps:$4 sm:$0xff]   ;;  %v2513_v9 = vld [vmem:[%s3657_s1 + $0x6e0] ss:$16 sps:$4 sm:$0xff]  }
  0x24   :  { %1472 = vmatpush2.bf16.msra.mxu1 %v2463_v35  ;;  %1432 = vmatprep.subr.bf16.mxu0 %v2464_v36  ;;  %v2518_v10 = vld [vmem:[%s3657_s1 + $0x4c4] ss:$16 sps:$4 sm:$0xff]   ;;  %v2516_v12 = vld [vmem:[%s3657_s1 + $0x4c0] ss:$16 sps:$4 sm:$0xff]  }
  0x25   :  { %1473 = vmatprep.subr.bf16.mxu1 %v2466_v37  ;;  %v2521_v11 = vld [vmem:[%s3657_s1 + $0x6c4] ss:$16 sps:$4 sm:$0xff]   ;;  %v2519_v13 = vld [vmem:[%s3657_s1 + $0x6c0] ss:$16 sps:$4 sm:$0xff]  }
  0x26   :  { %v2524_v14 = vld [vmem:[%s3657_s1 + $0x4a4] ss:$16 sps:$4 sm:$0xff]   ;;  %v2522_v17 = vld [vmem:[%s3657_s1 + $0x4a0] ss:$16 sps:$4 sm:$0xff]  }
  0x27   :  { %1433 = vmatpush2.bf16.msra.mxu0 %v2468_v38  ;;  %v2527_v15 = vld [vmem:[%s3657_s1 + $0x6a4] ss:$16 sps:$4 sm:$0xff]   ;;  %v2525_v18 = vld [vmem:[%s3657_s1 + $0x6a0] ss:$16 sps:$4 sm:$0xff]  }
  0x28   :  { %1474 = vmatpush2.bf16.msra.mxu1 %v2469_v39  ;;  %1434 = vmatprep.subr.bf16.mxu0 %v2470_v40  ;;  %v2530_v19 = vld [vmem:[%s3657_s1 + $0x484] ss:$16 sps:$4 sm:$0xff]   ;;  %v2528_v21 = vld [vmem:[%s3657_s1 + $0x480] ss:$16 sps:$4 sm:$0xff]  }
  0x29   :  { %1475 = vmatprep.subr.bf16.mxu1 %v2472_v41  ;;  %v2533_v20 = vld [vmem:[%s3657_s1 + $0x684] ss:$16 sps:$4 sm:$0xff]   ;;  %v2531_v22 = vld [vmem:[%s3657_s1 + $0x680] ss:$16 sps:$4 sm:$0xff]  }
  0x2a   :  { %v2536_v23 = vld [vmem:[%s3657_s1 + $0x464] ss:$16 sps:$4 sm:$0xff]   ;;  %v2534_v25 = vld [vmem:[%s3657_s1 + $0x460] ss:$16 sps:$4 sm:$0xff]  }
  0x2b   :  { %1435 = vmatpush2.bf16.msra.mxu0 %v2474_v42  ;;  %v2539_v24 = vld [vmem:[%s3657_s1 + $0x664] ss:$16 sps:$4 sm:$0xff]   ;;  %v2537_v26 = vld [vmem:[%s3657_s1 + $0x660] ss:$16 sps:$4 sm:$0xff]   ;;  %v2564_v42 = vld [vmem:[%s3657_s1 + $0xec] ss:$16 sps:$4 sm:$0xff]  }
  0x2c   :  { %1476 = vmatpush2.bf16.msra.mxu1 %v2475_v43  ;;  %1436 = vmatprep.subr.bf16.mxu0 %v2476_v44  ;;  %v2542_v27 = vld [vmem:[%s3657_s1 + $0x444] ss:$16 sps:$4 sm:$0xff]   ;;  %v2540_v29 = vld [vmem:[%s3657_s1 + $0x440] ss:$16 sps:$4 sm:$0xff]   ;;  %v3163_v44 = vld [vmem:[%s3656_s0 + $0x18] ss:$0 sps:$4 sm:$0xff]  }
  0x2d   :  { %1477 = vmatprep.subr.bf16.mxu1 %v2478_v45  ;;  %v2545_v28 = vld [vmem:[%s3657_s1 + $0x644] ss:$16 sps:$4 sm:$0xff]   ;;  %v2543_v30 = vld [vmem:[%s3657_s1 + $0x640] ss:$16 sps:$4 sm:$0xff]   ;;  %v2562_v45 = vld [vmem:[%s3657_s1 + $0xe8] ss:$16 sps:$4 sm:$0xff]  }
  0x2e   :  { %v2548_v31 = vld [vmem:[%s3657_s1 + $0x424] ss:$16 sps:$4 sm:$0xff]   ;;  %v2546_v34 = vld [vmem:[%s3657_s1 + $0x420] ss:$16 sps:$4 sm:$0xff]  }
  0x2f   :  { %1437 = vmatpush2.bf16.msra.mxu0 %v2480_v49  ;;  %v2551_v32 = vld [vmem:[%s3657_s1 + $0x624] ss:$16 sps:$4 sm:$0xff]   ;;  %v2549_v36 = vld [vmem:[%s3657_s1 + $0x620] ss:$16 sps:$4 sm:$0xff]  }
  0x30   :  { %1478 = vmatpush2.bf16.msra.mxu1 %v2481_v50  ;;  %1438 = vmatprep.subr.bf16.mxu0 %v2482_v52  ;;  %v3126_v33 = vld [vmem:[%s3656_s0 + $0x10] sm:$0xff]  ;;  %v2568_v50 = vld [vmem:[%s3657_s1 + $0xc8] ss:$16 sps:$4 sm:$0xff]  }
  0x31   :  { %1479 = vmatprep.subr.bf16.mxu1 %v2484_v53  ;;  %v3133_v35 = vcombine.high %v3126_v33, %v3126_v33  ;;  %v2554_v37 = vld [vmem:[%s3657_s1 + $0x404] ss:$16 sps:$4 sm:$0xff]   ;;  %v2552_v39 = vld [vmem:[%s3657_s1 + $0x400] ss:$16 sps:$4 sm:$0xff]   ;;  %v2576_v53 = vld [vmem:[%s3657_s1 + $0xac] ss:$16 sps:$4 sm:$0xff]  }
  0x32   :  { %v2557_v38 = vld [vmem:[%s3657_s1 + $0x604] ss:$16 sps:$4 sm:$0xff]   ;;  %v2555_v40 = vld [vmem:[%s3657_s1 + $0x600] ss:$16 sps:$4 sm:$0xff]  }
  0x33   :  { %1439 = vmatpush2.bf16.msra.mxu0 %v2486_v54  ;;  %v2560_v41 = vld [vmem:[%s3657_s1 + $0x5e4] ss:$16 sps:$4 sm:$0xff]   ;;  %v2558_v43 = vld [vmem:[%s3657_s1 + $0x5e0] ss:$16 sps:$4 sm:$0xff]  }
  0x34   :  { %1480 = vmatpush2.bf16.msra.mxu1 %v2487_v55  ;;  %1440 = vmatprep.subr.bf16.mxu0 %v2488_v56  ;;  %v2567_v46 = vld [vmem:[%s3657_s1 + $0x5c4] ss:$16 sps:$4 sm:$0xff]   ;;  %v2565_v49 = vld [vmem:[%s3657_s1 + $0x5c0] ss:$16 sps:$4 sm:$0xff]   ;;  %v2574_v55 = vld [vmem:[%s3657_s1 + $0xa8] ss:$16 sps:$4 sm:$0xff]  }
  0x35   :  { %1481 = vmatprep.subr.bf16.mxu1 %v2490_v57  ;;  %v2573_v52 = vld [vmem:[%s3657_s1 + $0x5a4] ss:$16 sps:$4 sm:$0xff]   ;;  %v2571_v54 = vld [vmem:[%s3657_s1 + $0x5a0] ss:$16 sps:$4 sm:$0xff]  }
  0x36   :  { %v2579_v56 = vld [vmem:[%s3657_s1 + $0x584] ss:$16 sps:$4 sm:$0xff]   ;;  %v2577_v57 = vld [vmem:[%s3657_s1 + $0x580] ss:$16 sps:$4 sm:$0xff]  }
  0x37   :  { %1441 = vmatpush2.bf16.msra.mxu0 %v2492_v58  ;;  %v2580_v58 = vld [vmem:[%s3657_s1 + $0x88] ss:$16 sps:$4 sm:$0xff]  }
  0x38   :  { %1482 = vmatpush2.bf16.msra.mxu1 %v2493_v59  ;;  %1442 = vmatprep.subr.bf16.mxu0 %v2494_v60  ;;  %v2585_v59 = vld [vmem:[%s3657_s1 + $0x564] ss:$16 sps:$4 sm:$0xff]   ;;  %v2588_v60 = vld [vmem:[%s3657_s1 + $0x6c] ss:$16 sps:$4 sm:$0xff]  }
  0x39   :  { %1483 = vmatprep.subr.bf16.mxu1 %v2496_v61  ;;  %v2583_v61 = vld [vmem:[%s3657_s1 + $0x560] ss:$16 sps:$4 sm:$0xff]  }
  0x3b   :  { %1443 = vmatpush2.bf16.msra.mxu0 %v2498_v62  ;;  %v2586_v62 = vld [vmem:[%s3657_s1 + $0x68] ss:$16 sps:$4 sm:$0xff]  }
  0x3c   :  { %1484 = vmatpush2.bf16.msra.mxu1 %v2499_v63  ;;  %1444 = vmatprep.subr.bf16.mxu0 %v2500_v0  ;;  %v2591_v63 = vld [vmem:[%s3657_s1 + $0x544] ss:$16 sps:$4 sm:$0xff]   ;;  %v2594_v0 = vld [vmem:[%s3657_s1 + $0x4c] ss:$16 sps:$4 sm:$0xff]  }
  0x3d   :  { %1485 = vmatprep.subr.bf16.mxu1 %v2502_v1  ;;  %v2589_v1 = vld [vmem:[%s3657_s1 + $0x540] ss:$16 sps:$4 sm:$0xff]  }
  0x3f   :  { %1445 = vmatpush2.bf16.msra.mxu0 %v2504_v2  ;;  %v2592_v2 = vld [vmem:[%s3657_s1 + $0x48] ss:$16 sps:$4 sm:$0xff]  }
  0x40   :  { %1486 = vmatpush2.bf16.msra.mxu1 %v2505_v3  ;;  %1496 = vmatprep.subr.bf16.mxu0 %v2512_v4  ;;  %v2597_v3 = vld [vmem:[%s3657_s1 + $0x524] ss:$16 sps:$4 sm:$0xff]   ;;  %v2600_v4 = vld [vmem:[%s3657_s1 + $0x2c] ss:$16 sps:$4 sm:$0xff]  }
  0x41   :  { %1537 = vmatprep.subr.bf16.mxu1 %v2515_v5  ;;  %v2595_v5 = vld [vmem:[%s3657_s1 + $0x520] ss:$16 sps:$4 sm:$0xff]  }
  0x42   :  { %1447 = vmatmul.mubr.bf16.vlgmr.msra.gmra.mxu0 %v3044_v6 }
  0x43   :  { %1488 = vmatmul.mubr.bf16.vlgmr.msra.gmra.mxu1 %v3046_v7  ;;  %1497 = vmatpush1.bf16.msra.mxu0 %v2510_v8  ;;  %v2598_v8 = vld [vmem:[%s3657_s1 + $0x28] ss:$16 sps:$4 sm:$0xff]  }
  0x44   :  { %1538 = vmatpush1.bf16.msra.mxu1 %v2513_v9  ;;  %1498 = vmatprep.subr.bf16.mxu0 %v2518_v10  ;;  %v2603_v9 = vld [vmem:[%s3657_s1 + $0x504] ss:$16 sps:$4 sm:$0xff]   ;;  %v2606_v10 = vld [vmem:[%s3657_s1 + $0xc] ss:$16 sps:$4 sm:$0xff]  }
  0x45   :  { %1539 = vmatprep.subr.bf16.mxu1 %v2521_v11  ;;  %1569 = vmatprep.mubr.bf16.mxu1 %v2807_v16  ;;  %v2601_v11 = vld [vmem:[%s3657_s1 + $0x500] ss:$16 sps:$4 sm:$0xff]  }
  0x46   :  { %1528 = vmatprep.mubr.bf16.mxu0 %v3133_v35 }
  0x47   :  { %1499 = vmatpush1.bf16.msra.mxu0 %v2516_v12  ;;  %v2604_v12 = vld [vmem:[%s3657_s1 + $0x8] ss:$16 sps:$4 sm:$0xff]  }
  0x48   :  { %1540 = vmatpush1.bf16.msra.mxu1 %v2519_v13  ;;  %1500 = vmatprep.subr.bf16.mxu0 %v2524_v14  ;;  %v2611_v13 = vld [vmem:[%s3657_s1 + $0x1ec] ss:$16 sps:$4 sm:$0xff]  }
  0x49   :  { %1541 = vmatprep.subr.bf16.mxu1 %v2527_v15  ;;  %v2614_v14 = vld [vmem:[%s3657_s1 + $0x2ec] ss:$16 sps:$4 sm:$0xff]   ;;  %v3262_v15 = vcombine.low %v3126_v33, %v3126_v33  ;;  %v2636_v33 = vld [vmem:[%s3657_s1 + $0x268] ss:$16 sps:$4 sm:$0xff]  }
  0x4b   :  { %1501 = vmatpush1.bf16.msra.mxu0 %v2522_v17  ;;  %v2609_v17 = vld [vmem:[%s3657_s1 + $0x1e8] ss:$16 sps:$4 sm:$0xff]  }
  0x4c   :  { %1542 = vmatpush1.bf16.msra.mxu1 %v2525_v18  ;;  %1502 = vmatprep.subr.bf16.mxu0 %v2530_v19  ;;  %v2612_v18 = vld [vmem:[%s3657_s1 + $0x2e8] ss:$16 sps:$4 sm:$0xff]   ;;  %v2617_v19 = vld [vmem:[%s3657_s1 + $0x1cc] ss:$16 sps:$4 sm:$0xff]  }
  0x4d   :  { %1543 = vmatprep.subr.bf16.mxu1 %v2533_v20  ;;  %v2620_v20 = vld [vmem:[%s3657_s1 + $0x2cc] ss:$16 sps:$4 sm:$0xff]  }
  0x4f   :  { %1503 = vmatpush1.bf16.msra.mxu0 %v2528_v21  ;;  %v2615_v21 = vld [vmem:[%s3657_s1 + $0x1c8] ss:$16 sps:$4 sm:$0xff]  }
  0x50   :  { %1544 = vmatpush1.bf16.msra.mxu1 %v2531_v22  ;;  %1504 = vmatprep.subr.bf16.mxu0 %v2536_v23  ;;  %v2618_v22 = vld [vmem:[%s3657_s1 + $0x2c8] ss:$16 sps:$4 sm:$0xff]   ;;  %v2623_v23 = vld [vmem:[%s3657_s1 + $0x1ac] ss:$16 sps:$4 sm:$0xff]  }
  0x51   :  { %1545 = vmatprep.subr.bf16.mxu1 %v2539_v24  ;;  %v2626_v24 = vld [vmem:[%s3657_s1 + $0x2ac] ss:$16 sps:$4 sm:$0xff]  }
  0x53   :  { %1505 = vmatpush1.bf16.msra.mxu0 %v2534_v25  ;;  %v2621_v25 = vld [vmem:[%s3657_s1 + $0x1a8] ss:$16 sps:$4 sm:$0xff]  }
  0x54   :  { %1546 = vmatpush1.bf16.msra.mxu1 %v2537_v26  ;;  %1506 = vmatprep.subr.bf16.mxu0 %v2542_v27  ;;  %v2624_v26 = vld [vmem:[%s3657_s1 + $0x2a8] ss:$16 sps:$4 sm:$0xff]   ;;  %v2629_v27 = vld [vmem:[%s3657_s1 + $0x18c] ss:$16 sps:$4 sm:$0xff]  }
  0x55   :  { %1547 = vmatprep.subr.bf16.mxu1 %v2545_v28  ;;  %v2627_v28 = vld [vmem:[%s3657_s1 + $0x188] ss:$16 sps:$4 sm:$0xff]  }
  0x57   :  { %1507 = vmatpush1.bf16.msra.mxu0 %v2540_v29  ;;  %v2630_v29 = vld [vmem:[%s3657_s1 + $0x288] ss:$16 sps:$4 sm:$0xff]  }
  0x58   :  { %1548 = vmatpush1.bf16.msra.mxu1 %v2543_v30  ;;  %1508 = vmatprep.subr.bf16.mxu0 %v2548_v31  ;;  %v2635_v30 = vld [vmem:[%s3657_s1 + $0x16c] ss:$16 sps:$4 sm:$0xff]  }
  0x59   :  { %1549 = vmatprep.subr.bf16.mxu1 %v2551_v32  ;;  %v2638_v31 = vld [vmem:[%s3657_s1 + $0x26c] ss:$16 sps:$4 sm:$0xff]   ;;  %v2633_v32 = vld [vmem:[%s3657_s1 + $0x168] ss:$16 sps:$4 sm:$0xff]  }
  0x5b   :  { %1509 = vmatpush1.bf16.msra.mxu0 %v2546_v34  ;;  %v2641_v34 = vld [vmem:[%s3657_s1 + $0x14c] ss:$16 sps:$4 sm:$0xff]  }
  0x5c   :  { %1550 = vmatpush1.bf16.msra.mxu1 %v2549_v36  ;;  %1510 = vmatprep.subr.bf16.mxu0 %v2554_v37  ;;  %v2644_v36 = vld [vmem:[%s3657_s1 + $0x24c] ss:$16 sps:$4 sm:$0xff]   ;;  %v2639_v37 = vld [vmem:[%s3657_s1 + $0x148] ss:$16 sps:$4 sm:$0xff]  }
  0x5d   :  { %1551 = vmatprep.subr.bf16.mxu1 %v2557_v38  ;;  %v2642_v38 = vld [vmem:[%s3657_s1 + $0x248] ss:$16 sps:$4 sm:$0xff]  }
  0x5f   :  { %1511 = vmatpush1.bf16.msra.mxu0 %v2552_v39  ;;  %v2647_v39 = vld [vmem:[%s3657_s1 + $0x12c] ss:$16 sps:$4 sm:$0xff]  }
  0x60   :  { %1552 = vmatpush1.bf16.msra.mxu1 %v2555_v40  ;;  %1512 = vmatprep.subr.bf16.mxu0 %v2560_v41  ;;  %v2650_v40 = vld [vmem:[%s3657_s1 + $0x22c] ss:$16 sps:$4 sm:$0xff]   ;;  %v2645_v41 = vld [vmem:[%s3657_s1 + $0x128] ss:$16 sps:$4 sm:$0xff]  }
  0x61   :  { %1578 = vmatprep.subr.bf16.mxu1 %v2564_v42  ;;  %v2648_v42 = vld [vmem:[%s3657_s1 + $0x228] ss:$16 sps:$4 sm:$0xff]  }
  0x63   :  { %1570 = vmatmul.mubr.bf16.vlgmr.msra.gmra.mxu1 %v3163_v44  ;;  %1513 = vmatpush2.bf16.msra.mxu0 %v2558_v43  ;;  %v2653_v43 = vld [vmem:[%s3657_s1 + $0x10c] ss:$16 sps:$4 sm:$0xff]  }
  0x64   :  { %1579 = vmatpush1.bf16.msra.mxu1 %v2562_v45  ;;  %1514 = vmatprep.subr.bf16.mxu0 %v2567_v46  ;;  %v2656_v45 = vld [vmem:[%s3657_s1 + $0x20c] ss:$16 sps:$4 sm:$0xff]   ;;  %v2651_v46 = vld [vmem:[%s3657_s1 + $0x108] ss:$16 sps:$4 sm:$0xff]  }
  0x65   :  { %1580 = vmatprep.subr.bf16.mxu1 %v2570_v48  ;;  %1610 = vmatprep.mubr.bf16.mxu1 %v2975_v47  ;;  %v2582_v47 = vld [vmem:[%s3657_s1 + $0x8c] ss:$16 sps:$4 sm:$0xff]   ;;  %v2654_v48 = vld [vmem:[%s3657_s1 + $0x208] ss:$16 sps:$4 sm:$0xff]  }
  0x67   :  { %1515 = vmatpush2.bf16.msra.mxu0 %v2565_v49  ;;  %v2659_v49 = vld [vmem:[%s3657_s1 + $0x3ec] ss:$16 sps:$4 sm:$0xff]  }
  0x68   :  { %1581 = vmatpush1.bf16.msra.mxu1 %v2568_v50  ;;  %1516 = vmatprep.subr.bf16.mxu0 %v2573_v52  ;;  %v2662_v50 = vld [vmem:[%s3657_s1 + $0x4ec] ss:$16 sps:$4 sm:$0xff]   ;;  %v2657_v52 = vld [vmem:[%s3657_s1 + $0x3e8] ss:$16 sps:$4 sm:$0xff]  }
  0x69   :  { %1582 = vmatprep.subr.bf16.mxu1 %v2576_v53  ;;  %v2660_v53 = vld [vmem:[%s3657_s1 + $0x4e8] ss:$16 sps:$4 sm:$0xff]  }
  0x6b   :  { %1517 = vmatpush2.bf16.msra.mxu0 %v2571_v54  ;;  %v2665_v54 = vld [vmem:[%s3657_s1 + $0x3cc] ss:$16 sps:$4 sm:$0xff]  }
  0x6c   :  { %1583 = vmatpush1.bf16.msra.mxu1 %v2574_v55  ;;  %1518 = vmatprep.subr.bf16.mxu0 %v2579_v56  ;;  %v2668_v55 = vld [vmem:[%s3657_s1 + $0x4cc] ss:$16 sps:$4 sm:$0xff]   ;;  %v2663_v56 = vld [vmem:[%s3657_s1 + $0x3c8] ss:$16 sps:$4 sm:$0xff]  }
  0x6d   :  { %1584 = vmatprep.subr.bf16.mxu1 %v2582_v47  ;;  %v2666_v47 = vld [vmem:[%s3657_s1 + $0x4c8] ss:$16 sps:$4 sm:$0xff]  }
  0x6f   :  { %1519 = vmatpush2.bf16.msra.mxu0 %v2577_v57  ;;  %v2671_v57 = vld [vmem:[%s3657_s1 + $0x3ac] ss:$16 sps:$4 sm:$0xff]  }
  0x70   :  { %1585 = vmatpush1.bf16.msra.mxu1 %v2580_v58  ;;  %1520 = vmatprep.subr.bf16.mxu0 %v2585_v59  ;;  %v2674_v58 = vld [vmem:[%s3657_s1 + $0x4ac] ss:$16 sps:$4 sm:$0xff]   ;;  %v2669_v59 = vld [vmem:[%s3657_s1 + $0x3a8] ss:$16 sps:$4 sm:$0xff]  }
  0x71   :  { %1586 = vmatprep.subr.bf16.mxu1 %v2588_v60  ;;  %v2677_v60 = vld [vmem:[%s3657_s1 + $0x38c] ss:$16 sps:$4 sm:$0xff]  }
  0x73   :  { %1521 = vmatpush2.bf16.msra.mxu0 %v2583_v61  ;;  %v2680_v61 = vld [vmem:[%s3657_s1 + $0x48c] ss:$16 sps:$4 sm:$0xff]  }
  0x74   :  { %1587 = vmatpush1.bf16.msra.mxu1 %v2586_v62  ;;  %1522 = vmatprep.subr.bf16.mxu0 %v2591_v63  ;;  %v2675_v62 = vld [vmem:[%s3657_s1 + $0x388] ss:$16 sps:$4 sm:$0xff]   ;;  %v2683_v63 = vld [vmem:[%s3657_s1 + $0x36c] ss:$16 sps:$4 sm:$0xff]  }
  0x75   :  { %1588 = vmatprep.subr.bf16.mxu1 %v2594_v0  ;;  %v2686_v0 = vld [vmem:[%s3657_s1 + $0x46c] ss:$16 sps:$4 sm:$0xff]  }
  0x77   :  { %1523 = vmatpush2.bf16.msra.mxu0 %v2589_v1  ;;  %v2681_v1 = vld [vmem:[%s3657_s1 + $0x368] ss:$16 sps:$4 sm:$0xff]  }
  0x78   :  { %1589 = vmatpush1.bf16.msra.mxu1 %v2592_v2  ;;  %1524 = vmatprep.subr.bf16.mxu0 %v2597_v3  ;;  %v2684_v2 = vld [vmem:[%s3657_s1 + $0x468] ss:$16 sps:$4 sm:$0xff]  }
  0x79   :  { %1590 = vmatprep.subr.bf16.mxu1 %v2600_v4 }
  0x7b   :  { %1525 = vmatpush2.bf16.msra.mxu0 %v2595_v5 }
  0x7c   :  { %1591 = vmatpush1.bf16.msra.mxu1 %v2598_v8  ;;  %1526 = vmatprep.subr.bf16.mxu0 %v2603_v9 }
  0x7d   :  { %1592 = vmatprep.subr.bf16.mxu1 %v2606_v10 }
  0x7f   :  { %1527 = vmatpush2.bf16.msra.mxu0 %v2601_v11 }
  0x80   :  { %1593 = vmatpush1.bf16.msra.mxu1 %v2604_v12  ;;  %1619 = vmatprep.subr.bf16.mxu0 %v2614_v14 }
  0x81   :  { %1594 = vmatprep.subr.bf16.mxu1 %v2611_v13 }
  0x82   :  { %1529 = vmatmul.mubr.bf16.vlgmr.msra.gmra.mxu0 %v3262_v15 }
  0x83   :  { %1620 = vmatpush1.bf16.msra.mxu0 %v2612_v18  ;;  %1651 = vmatprep.mubr.bf16.mxu0 %v2986_v51  ;;  %v2632_v51 = vld [vmem:[%s3657_s1 + $0x28c] ss:$16 sps:$4 sm:$0xff]  }
  0x84   :  { %1595 = vmatpush2.bf16.msra.mxu1 %v2609_v17  ;;  %1621 = vmatprep.subr.bf16.mxu0 %v2620_v20 }
  0x85   :  { %1596 = vmatprep.subr.bf16.mxu1 %v2617_v19 }
  0x87   :  { %1622 = vmatpush1.bf16.msra.mxu0 %v2618_v22 }
  0x88   :  { %1597 = vmatpush2.bf16.msra.mxu1 %v2615_v21  ;;  %1623 = vmatprep.subr.bf16.mxu0 %v2626_v24 }
  0x89   :  { %1598 = vmatprep.subr.bf16.mxu1 %v2623_v23 }
  0x8b   :  { %1624 = vmatpush1.bf16.msra.mxu0 %v2624_v26 }
  0x8c   :  { %1599 = vmatpush2.bf16.msra.mxu1 %v2621_v25  ;;  %1625 = vmatprep.subr.bf16.mxu0 %v2632_v51 }
  0x8d   :  { %1600 = vmatprep.subr.bf16.mxu1 %v2629_v27 }
  0x8f   :  { %1626 = vmatpush1.bf16.msra.mxu0 %v2630_v29 }
  0x90   :  { %1601 = vmatpush2.bf16.msra.mxu1 %v2627_v28  ;;  %1627 = vmatprep.subr.bf16.mxu0 %v2638_v31 }
  0x91   :  { %1602 = vmatprep.subr.bf16.mxu1 %v2635_v30 }
  0x93   :  { %1628 = vmatpush1.bf16.msra.mxu0 %v2636_v33 }
  0x94   :  { %1603 = vmatpush2.bf16.msra.mxu1 %v2633_v32  ;;  %1629 = vmatprep.subr.bf16.mxu0 %v2644_v36 }
  0x95   :  { %1604 = vmatprep.subr.bf16.mxu1 %v2641_v34 }
  0x97   :  { %1630 = vmatpush1.bf16.msra.mxu0 %v2642_v38 }
  0x98   :  { %1605 = vmatpush2.bf16.msra.mxu1 %v2639_v37  ;;  %1631 = vmatprep.subr.bf16.mxu0 %v2650_v40 }
  0x99   :  { %1606 = vmatprep.subr.bf16.mxu1 %v2647_v39 }
  0x9b   :  { %1632 = vmatpush1.bf16.msra.mxu0 %v2648_v42 }
  0x9c   :  { %1607 = vmatpush2.bf16.msra.mxu1 %v2645_v41  ;;  %1633 = vmatprep.subr.bf16.mxu0 %v2656_v45 }
  0x9d   :  { %1608 = vmatprep.subr.bf16.mxu1 %v2653_v43 }
  0x9f   :  { %1634 = vmatpush1.bf16.msra.mxu0 %v2654_v48 }
  0xa0   :  { %1609 = vmatpush2.bf16.msra.mxu1 %v2651_v46  ;;  %1635 = vmatprep.subr.bf16.mxu0 %v2659_v49 }
  0xa1   :  { %1660 = vmatprep.subr.bf16.mxu1 %v2662_v50 }
  0xa3   :  { %1611 = vmatmul.mubr.bf16.vlgmr.msra.gmra.mxu1 %v3044_v6  ;;  %1636 = vmatpush2.bf16.msra.mxu0 %v2657_v52  ;;  %v2672_v6 = vld [vmem:[%s3657_s1 + $0x4a8] ss:$16 sps:$4 sm:$0xff]  }
  0xa4   :  { %1661 = vmatpush1.bf16.msra.mxu1 %v2660_v53  ;;  %1637 = vmatprep.subr.bf16.mxu0 %v2665_v54 }
  0xa5   :  { %1662 = vmatprep.subr.bf16.mxu1 %v2668_v55  ;;  %1692 = vmatprep.mubr.bf16.mxu1 %v3133_v35  ;;  %v2678_v35 = vld [vmem:[%s3657_s1 + $0x488] ss:$16 sps:$4 sm:$0xff]  }
  0xa7   :  { %1638 = vmatpush2.bf16.msra.mxu0 %v2663_v56 }
  0xa8   :  { %1663 = vmatpush1.bf16.msra.mxu1 %v2666_v47  ;;  %1639 = vmatprep.subr.bf16.mxu0 %v2671_v57 }
  0xa9   :  { %1664 = vmatprep.subr.bf16.mxu1 %v2674_v58 }
  0xab   :  { %1640 = vmatpush2.bf16.msra.mxu0 %v2669_v59 }
  0xac   :  { %1665 = vmatpush1.bf16.msra.mxu1 %v2672_v6  ;;  %1641 = vmatprep.subr.bf16.mxu0 %v2677_v60 }
  0xad   :  { %1666 = vmatprep.subr.bf16.mxu1 %v2680_v61 }
  0xaf   :  { %1642 = vmatpush2.bf16.msra.mxu0 %v2675_v62 }
  0xb0   :  { %1667 = vmatpush1.bf16.msra.mxu1 %v2678_v35 }
  0xb1   :  { %9 = vsyncpa [#allocation3], 0  ;;  %1643 = vmatprep.subr.bf16.mxu0 %v2683_v63  ;;  %1668 = vmatprep.subr.bf16.mxu1 %v2686_v0  ;;  %v2689_v3 = vld [vmem:[%s3657_s1 + $0x34c] ss:$16 sps:$4 sm:$0xff]   ;;  %v2687_v5 = vld [vmem:[%s3657_s1 + $0x348] ss:$16 sps:$4 sm:$0xff]  }
  0xb2   :  { %v2692_v4 = vld [vmem:[%s3657_s1 + $0x44c] ss:$16 sps:$4 sm:$0xff]   ;;  %v2690_v8 = vld [vmem:[%s3657_s1 + $0x448] ss:$16 sps:$4 sm:$0xff]   ;;  %v2755_v54 = vld [vmem:[%s3659_s3 + $0x70] sm:$0xff]  }
  0xb3   :  { %1644 = vmatpush2.bf16.msra.mxu0 %v2681_v1  ;;  %v2695_v9 = vld [vmem:[%s3657_s1 + $0x32c] ss:$16 sps:$4 sm:$0xff]   ;;  %v2693_v11 = vld [vmem:[%s3657_s1 + $0x328] ss:$16 sps:$4 sm:$0xff]   ;;  %v2756_v55 = vld [vmem:[%s3659_s3 + $0x30] sm:$0xff]  }
  0xb4   :  { %1669 = vmatpush1.bf16.msra.mxu1 %v2684_v2  ;;  %1645 = vmatprep.subr.bf16.mxu0 %v2689_v3  ;;  %v2698_v10 = vld [vmem:[%s3657_s1 + $0x42c] ss:$16 sps:$4 sm:$0xff]   ;;  %v2696_v12 = vld [vmem:[%s3657_s1 + $0x428] ss:$16 sps:$4 sm:$0xff]   ;;  %v2763_v59 = vld [vmem:[%s3659_s3 + $0x50] sm:$0xff]  }
  0xb5   :  { %1670 = vmatprep.subr.bf16.mxu1 %v2692_v4  ;;  %v2701_v13 = vld [vmem:[%s3657_s1 + $0x30c] ss:$16 sps:$4 sm:$0xff]   ;;  %v2699_v17 = vld [vmem:[%s3657_s1 + $0x308] ss:$16 sps:$4 sm:$0xff]   ;;  %v2764_v6 = vld [vmem:[%s3659_s3 + $0x10] sm:$0xff]  }
  0xb6   :  { %v2704_v14 = vld [vmem:[%s3657_s1 + $0x40c] ss:$16 sps:$4 sm:$0xff]   ;;  %v2702_v18 = vld [vmem:[%s3657_s1 + $0x408] ss:$16 sps:$4 sm:$0xff]   ;;  %v2767_v62 = vld [vmem:[%s3659_s3 + $0x40] sm:$0xff]  }
  0xb7   :  { %1646 = vmatpush2.bf16.msra.mxu0 %v2687_v5  ;;  %v2707_v19 = vld [vmem:[%s3657_s1 + $0x5ec] ss:$16 sps:$4 sm:$0xff]   ;;  %v2705_v21 = vld [vmem:[%s3657_s1 + $0x5e8] ss:$16 sps:$4 sm:$0xff]   ;;  %v2768_v35 = vld [vmem:[%s3659_s3] sm:$0xff]  }
  0xb8   :  { %1671 = vmatpush1.bf16.msra.mxu1 %v2690_v8  ;;  %1647 = vmatprep.subr.bf16.mxu0 %v2695_v9  ;;  %v2710_v20 = vld [vmem:[%s3657_s1 + $0x6ec] ss:$16 sps:$4 sm:$0xff]   ;;  %v2708_v22 = vld [vmem:[%s3657_s1 + $0x6e8] ss:$16 sps:$4 sm:$0xff]  }
  0xb9   :  { %1672 = vmatprep.subr.bf16.mxu1 %v2698_v10  ;;  %v2713_v23 = vld [vmem:[%s3657_s1 + $0x5cc] ss:$16 sps:$4 sm:$0xff]   ;;  %v2711_v25 = vld [vmem:[%s3657_s1 + $0x5c8] ss:$16 sps:$4 sm:$0xff]  }
  0xba   :  { %v2716_v24 = vld [vmem:[%s3657_s1 + $0x6cc] ss:$16 sps:$4 sm:$0xff]   ;;  %v2714_v26 = vld [vmem:[%s3657_s1 + $0x6c8] ss:$16 sps:$4 sm:$0xff]  }
  0xbb   :  { %1648 = vmatpush2.bf16.msra.mxu0 %v2693_v11  ;;  %v2719_v27 = vld [vmem:[%s3657_s1 + $0x5ac] ss:$16 sps:$4 sm:$0xff]   ;;  %v2717_v51 = vld [vmem:[%s3657_s1 + $0x5a8] ss:$16 sps:$4 sm:$0xff]   ;;  %v2771_v11 = vld [vmem:[%s3659_s3 + $0xf0] sm:$0xff]  }
  0xbc   :  { %1673 = vmatpush1.bf16.msra.mxu1 %v2696_v12  ;;  %1649 = vmatprep.subr.bf16.mxu0 %v2701_v13  ;;  %v2720_v28 = vld [vmem:[%s3657_s1 + $0x6a8] ss:$16 sps:$4 sm:$0xff]   ;;  %v2725_v29 = vld [vmem:[%s3657_s1 + $0x58c] ss:$16 sps:$4 sm:$0xff]   ;;  %v2772_v12 = vld [vmem:[%s3659_s3 + $0xb0] sm:$0xff]  }
  0xbd   :  { %1674 = vmatprep.subr.bf16.mxu1 %v2704_v14  ;;  %v2723_v30 = vld [vmem:[%s3657_s1 + $0x588] ss:$16 sps:$4 sm:$0xff]   ;;  %v2731_v32 = vld [vmem:[%s3657_s1 + $0x56c] ss:$16 sps:$4 sm:$0xff]  }
  0xbe   :  { %v2726_v31 = vld [vmem:[%s3657_s1 + $0x688] ss:$16 sps:$4 sm:$0xff]   ;;  %v2734_v33 = vld [vmem:[%s3657_s1 + $0x66c] ss:$16 sps:$4 sm:$0xff]  }
  0xbf   :  { %1650 = vmatpush2.bf16.msra.mxu0 %v2699_v17  ;;  %v2729_v34 = vld [vmem:[%s3657_s1 + $0x568] ss:$16 sps:$4 sm:$0xff]   ;;  %v2737_v37 = vld [vmem:[%s3657_s1 + $0x54c] ss:$16 sps:$4 sm:$0xff]   ;;  %v2775_v17 = vld [vmem:[%s3659_s3 + $0xe0] sm:$0xff]  }
  0xc0   :  { %1675 = vmatpush1.bf16.msra.mxu1 %v2702_v18  ;;  %1701 = vmatprep.subr.bf16.mxu0 %v2710_v20  ;;  %v2732_v36 = vld [vmem:[%s3657_s1 + $0x668] ss:$16 sps:$4 sm:$0xff]   ;;  %v2740_v38 = vld [vmem:[%s3657_s1 + $0x64c] ss:$16 sps:$4 sm:$0xff]   ;;  %v2776_v18 = vld [vmem:[%s3659_s3 + $0xa0] sm:$0xff]  }
  0xc1   :  { %1676 = vmatprep.subr.bf16.mxu1 %v2707_v19  ;;  %v2735_v39 = vld [vmem:[%s3657_s1 + $0x548] ss:$16 sps:$4 sm:$0xff]   ;;  %v2743_v41 = vld [vmem:[%s3657_s1 + $0x52c] ss:$16 sps:$4 sm:$0xff]  }
  0xc2   :  { %1652 = vmatmul.mubr.bf16.vlgmr.msra.gmra.mxu0 %v3046_v7  ;;  %v2722_v7 = vld [vmem:[%s3657_s1 + $0x6ac] ss:$16 sps:$4 sm:$0xff]   ;;  %v2738_v40 = vld [vmem:[%s3657_s1 + $0x648] ss:$16 sps:$4 sm:$0xff]  }
  0xc3   :  { %1702 = vmatpush1.bf16.msra.mxu0 %v2708_v22  ;;  %1733 = vmatprep.mubr.bf16.mxu0 %v2807_v16  ;;  %v2728_v16 = vld [vmem:[%s3657_s1 + $0x68c] ss:$16 sps:$4 sm:$0xff]   ;;  %v2741_v43 = vld [vmem:[%s3657_s1 + $0x528] ss:$16 sps:$4 sm:$0xff]   ;;  %v2780_v22 = vld [vmem:[%s3659_s3 + $0x90] sm:$0xff]  }
  0xc4   :  { %1677 = vmatpush2.bf16.msra.mxu1 %v2705_v21  ;;  %1703 = vmatprep.subr.bf16.mxu0 %v2716_v24  ;;  %v2746_v42 = vld [vmem:[%s3657_s1 + $0x62c] ss:$16 sps:$4 sm:$0xff]   ;;  %v2744_v45 = vld [vmem:[%s3657_s1 + $0x628] ss:$16 sps:$4 sm:$0xff]   ;;  %v2779_v21 = vld [vmem:[%s3659_s3 + $0xd0] sm:$0xff]  }
  0xc5   :  { %1678 = vmatprep.subr.bf16.mxu1 %v2713_v23  ;;  %v2749_v46 = vld [vmem:[%s3657_s1 + $0x50c] ss:$16 sps:$4 sm:$0xff]   ;;  %v2747_v49 = vld [vmem:[%s3657_s1 + $0x508] ss:$16 sps:$4 sm:$0xff]  }
  0xc6   :  { %v2752_v48 = vld [vmem:[%s3657_s1 + $0x60c] ss:$16 sps:$4 sm:$0xff]   ;;  %v2750_v50 = vld [vmem:[%s3657_s1 + $0x608] ss:$16 sps:$4 sm:$0xff]  }
  0xc7   :  { %1704 = vmatpush1.bf16.msra.mxu0 %v2714_v26  ;;  %v2753_v52 = vld [vmem:[%s3659_s3 + $0x78] sm:$0xff]   ;;  %v2757_v56 = vld [vmem:[%s3659_s3 + $0x68] sm:$0xff]  }
  0xc8   :  { %1679 = vmatpush2.bf16.msra.mxu1 %v2711_v25  ;;  %1705 = vmatprep.subr.bf16.mxu0 %v2722_v7  ;;  %v2754_v53 = vld [vmem:[%s3659_s3 + $0x38] sm:$0xff]   ;;  %v2758_v47 = vld [vmem:[%s3659_s3 + $0x28] sm:$0xff]  }
  0xc9   :  { %1680 = vmatprep.subr.bf16.mxu1 %v2719_v27  ;;  %v2761_v57 = vld [vmem:[%s3659_s3 + $0x58] sm:$0xff]   ;;  %v2765_v60 = vld [vmem:[%s3659_s3 + $0x48] sm:$0xff]  }
  0xca   :  { %v2762_v58 = vld [vmem:[%s3659_s3 + $0x18] sm:$0xff]   ;;  %v2766_v61 = vld [vmem:[%s3659_s3 + $0x8] sm:$0xff]  }
  0xcb   :  { %1706 = vmatpush1.bf16.msra.mxu0 %v2720_v28  ;;  %v2769_v9 = vld [vmem:[%s3659_s3 + $0xf8] sm:$0xff]   ;;  %v2773_v13 = vld [vmem:[%s3659_s3 + $0xe8] sm:$0xff]   ;;  %v2784_v28 = vld [vmem:[%s3659_s3 + $0x80] sm:$0xff]  }
  0xcc   :  { %1681 = vmatpush2.bf16.msra.mxu1 %v2717_v51  ;;  %1707 = vmatprep.subr.bf16.mxu0 %v2728_v16  ;;  %v2770_v10 = vld [vmem:[%s3659_s3 + $0xb8] sm:$0xff]   ;;  %v2774_v14 = vld [vmem:[%s3659_s3 + $0xa8] sm:$0xff]   ;;  %v2783_v51 = vld [vmem:[%s3659_s3 + $0xc0] sm:$0xff]  }
  0xcd   :  { %1682 = vmatprep.subr.bf16.mxu1 %v2725_v29  ;;  %v2777_v19 = vld [vmem:[%s3659_s3 + $0xd8] sm:$0xff]   ;;  %v2781_v25 = vld [vmem:[%s3659_s3 + $0xc8] sm:$0xff]   ;;  %v249_v29 = vlaneseq }
  0xce   :  { %v2778_v20 = vld [vmem:[%s3659_s3 + $0x98] sm:$0xff]   ;;  %v2782_v26 = vld [vmem:[%s3659_s3 + $0x88] sm:$0xff]  }
  0xcf   :  { %1708 = vmatpush1.bf16.msra.mxu0 %v2726_v31  ;;  %v250_v16 = vshrl.u32 %v249_v29, 7  ;;  %v247_v31 = vld [vmem:[%s3658_s2] sm:$0xf]  ;;  %s2808_s2 = smov [#allocation2]  }
  0xd0   :  { %1683 = vmatpush2.bf16.msra.mxu1 %v2723_v30  ;;  %1709 = vmatprep.subr.bf16.mxu0 %v2734_v33 }
  0xd1   :  { %1684 = vmatprep.subr.bf16.mxu1 %v2731_v32  ;;  %v251_v30 = vsub.s32 0, %v250_v16  ;;  %v255_v32 = vsub.s32 1, %v250_v16 }
  0xd3   :  { %1710 = vmatpush1.bf16.msra.mxu0 %v2732_v36  ;;  %v252_v33 = vrot.slane %v247_v31, %v251_v30 }
  0xd4   :  { %1685 = vmatpush2.bf16.msra.mxu1 %v2729_v34  ;;  %1711 = vmatprep.subr.bf16.mxu0 %v2740_v38  ;;  %v256_v34 = vrot.slane %v247_v31, %v255_v32 }
  0xd5   :  { %1686 = vmatprep.subr.bf16.mxu1 %v2737_v37 }
  0xd7   :  { %1712 = vmatpush1.bf16.msra.mxu0 %v2738_v40 }
  0xd8   :  { %1687 = vmatpush2.bf16.msra.mxu1 %v2735_v39  ;;  %1713 = vmatprep.subr.bf16.mxu0 %v2746_v42 }
  0xd9   :  { %1688 = vmatprep.subr.bf16.mxu1 %v2743_v41 }
  0xdb   :  { %1714 = vmatpush1.bf16.msra.mxu0 %v2744_v45 }
  0xdc   :  { %1689 = vmatpush2.bf16.msra.mxu1 %v2741_v43  ;;  %1715 = vmatprep.subr.bf16.mxu0 %v2752_v48 }
  0xdd   :  { %1690 = vmatprep.subr.bf16.mxu1 %v2749_v46 }
  0xdf   :  { %1716 = vmatpush1.bf16.msra.mxu0 %v2750_v50 }
  0xe0   :  { %1691 = vmatpush2.bf16.msra.mxu1 %v2747_v49  ;;  %2364 = vmatprep.subr.bf16.mxu0 %v2753_v52 }
  0xe1   :  { %2386 = vmatprep.subr.bf16.mxu1 %v2769_v9 }
  0xe2   :  { %1734 = vmatmul.mubr.bf16.vlgmr.msra.gmra.mxu0 %v3163_v44  ;;  %v2759_v44 = vld [vmem:[%s3659_s3 + $0x60] sm:$0xff]  }
  0xe3   :  { %1693 = vmatmul.mubr.bf16.vlgmr.msra.gmra.mxu1 %v3262_v15  ;;  %2365 = vmatpush3.bf16.msra.mxu0 %v2754_v53  ;;  %v2760_v15 = vld [vmem:[%s3659_s3 + $0x20] sm:$0xff]   ;;  %s2093_s3 = sshll.u32 %s2808_s2, 4  ;;  %s2094_s3 = int_to_ptr.vmem [resolvable:$true] %s2093_s3 }
  0xe4   :  { %2366 = vmatprep.subr.bf16.mxu0 %v2755_v54  ;;  %2387 = vmatpush3.bf16.msra.mxu1 %v2770_v10  ;;  %s2785_s28 = scalar_lea.vmem %s2094_s3, 128  ;;  %p2790_p1 = scmp.lt.s32.totalorder %s2094_s3, %s2094_s3 }
  0xe5   :  { %2388 = vmatprep.subr.bf16.mxu1 %v2771_v11  ;;  %p2786_p0 = scmp.ne.s32.totalorder %s2094_s3, %s2785_s28  ;;  %p2791_p2 = scmp.lt.s32.totalorder %s2785_s28, %s2785_s28 }
  0xe7   :  { %2367 = vmatpush3.bf16.msra.mxu0 %v2756_v55  ;;  %p2792_p3 = por %p2791_p2, %p2790_p1 }
  0xe8   :  { %2368 = vmatprep.subr.bf16.mxu0 %v2757_v56  ;;  %2389 = vmatpush3.bf16.msra.mxu1 %v2772_v12 }
  0xe9   :  { %2390 = vmatprep.subr.bf16.mxu1 %v2773_v13  ;;  %p2793_p4 = pnand %p2792_p3, %p2786_p0 }
  0xeb   :  { %2369 = vmatpush3.bf16.msra.mxu0 %v2758_v47 }
  0xec   :  { %2370 = vmatprep.subr.bf16.mxu0 %v2759_v44  ;;  %2391 = vmatpush3.bf16.msra.mxu1 %v2774_v14 }
  0xed   :  { %2392 = vmatprep.subr.bf16.mxu1 %v2775_v17 }
  0xef   :  { %2371 = vmatpush3.bf16.msra.mxu0 %v2760_v15 }
  0xf0   :  { %2372 = vmatprep.subr.bf16.mxu0 %v2761_v57  ;;  %2393 = vmatpush3.bf16.msra.mxu1 %v2776_v18 }
  0xf1   :  { %2394 = vmatprep.subr.bf16.mxu1 %v2777_v19 }
  0xf3   :  { %2373 = vmatpush3.bf16.msra.mxu0 %v2762_v58 }
  0xf4   :  { %2374 = vmatprep.subr.bf16.mxu0 %v2763_v59  ;;  %2395 = vmatpush3.bf16.msra.mxu1 %v2778_v20 }
  0xf5   :  { %2396 = vmatprep.subr.bf16.mxu1 %v2779_v21 }
  0xf7   :  { %2375 = vmatpush3.bf16.msra.mxu0 %v2764_v6  ;;  %v259_v6 = vsub.s32 2, %v250_v16 }
  0xf8   :  { %2376 = vmatprep.subr.bf16.mxu0 %v2765_v60  ;;  %2397 = vmatpush3.bf16.msra.mxu1 %v2780_v22  ;;  %v263_v60 = vsub.s32 3, %v250_v16 }
  0xf9   :  { %2398 = vmatprep.subr.bf16.mxu1 %v2781_v25 }
  0xfb   :  { %2377 = vmatpush3.bf16.msra.mxu0 %v2766_v61  ;;  %v260_v61 = vrot.slane %v247_v31, %v259_v6 }
  0xfc   :  { %2378 = vmatprep.subr.bf16.mxu0 %v2767_v62  ;;  %2399 = vmatpush3.bf16.msra.mxu1 %v2782_v26  ;;  %v264_v62 = vrot.slane %v247_v31, %v263_v60 }
  0xfd   :  { %2400 = vmatprep.subr.bf16.mxu1 %v2783_v51 }
  0xff   :  { %2379 = vmatpush3.bf16.msra.mxu0 %v2768_v35 }
 0x100   :  { %2401 = vmatpush3.bf16.msra.mxu1 %v2784_v28 }
 0x102   :  { %v1448_v63 = vpop.f32.mrf.mxu0 }
 0x103   :  { %v1489_v0 = vpop.f32.mrf.mxu1  ;;  %v1449_v36 = vadd.f32 %v1448_v63, %v252_v33 }
 0x104   :  { %v1450_v1 = vpop.f32.mrf.mxu0 }
 0x105   :  { %v1491_v2 = vpop.f32.mrf.mxu1  ;;  %v1451_v37 = vadd.f32 %v1450_v1, %v256_v34  ;;  %v1490_v38 = vadd.f32 %v1489_v0, %v1449_v36 }
 0x106   :  { %v1452_v3 = vpop.f32.mrf.mxu0 }
 0x107   :  { %v1493_v4 = vpop.f32.mrf.mxu1  ;;  %v1492_v40 = vadd.f32 %v1491_v2, %v1451_v37 }
 0x108   :  { %v1453_v5 = vpop.f32.mrf.mxu0 }
 0x109   :  { %v1494_v8 = vpop.f32.mrf.mxu1 }
 0x123   :  { %v1571_v23 = vpop.f32.mrf.mxu1 }
 0x125   :  { %v1573_v24 = vpop.f32.mrf.mxu1 }
 0x127   :  { %v1575_v27 = vpop.f32.mrf.mxu1 }
 0x129   :  { %v1576_v7 = vpop.f32.mrf.mxu1 }
 0x142   :  { %v1530_v39 = vpop.f32.mrf.mxu0 }
 0x143   :  { %v1531_v41 = vadd.f32 %v1530_v39, %v1490_v38 }
 0x144   :  { %v1532_v42 = vpop.f32.mrf.mxu0 }
 0x145   :  { %v1572_v43 = vadd.f32 %v1571_v23, %v1531_v41  ;;  %v1533_v45 = vadd.f32 %v1532_v42, %v1492_v40 }
 0x146   :  { %v1534_v46 = vpop.f32.mrf.mxu0 }
 0x147   :  { %v1574_v48 = vadd.f32 %v1573_v24, %v1533_v45  ;;  %v1742_v49 = vmax.f32 %v1572_v43, 0.0 }
 0x148   :  { %v1535_v50 = vpop.f32.mrf.mxu0 }
 0x149   :  { %v1743_v52 = vmax.f32 %v1574_v48, 0.0  ;;  %v1746_v54 = vpack.c.bf16 %v1742_v49, %v1742_v49 }
 0x14b   :  { %v1747_v53 = vpack.c.bf16 %v1743_v52, %v1743_v52 }
 0x14d   :  { %2038 = vmatprep.mubr.bf16.mxu0 %v1747_v53 }
 0x14e   :  { %2039 = vmatmul.mubr.bf16.vlgmr.msra.gmra.mxu0 %v1746_v54 }
 0x163   :  { %v1612_v55 = vpop.f32.mrf.mxu1 }
 0x164   :  { %v1613_v35 = vadd.f32 %v1612_v55, %v260_v61 }
 0x165   :  { %v1614_v56 = vpop.f32.mrf.mxu1 }
 0x166   :  { %v1615_v63 = vadd.f32 %v1614_v56, %v264_v62 }
 0x167   :  { %v1616_v47 = vpop.f32.mrf.mxu1 }
 0x169   :  { %v1617_v44 = vpop.f32.mrf.mxu1 }
 0x182   :  { %v1653_v15 = vpop.f32.mrf.mxu0 }
 0x183   :  { %v1654_v0 = vadd.f32 %v1653_v15, %v1613_v35 }
 0x184   :  { %v1655_v57 = vpop.f32.mrf.mxu0 }
 0x185   :  { %v1656_v3 = vadd.f32 %v1655_v57, %v1615_v63 }
 0x186   :  { %v1657_v58 = vpop.f32.mrf.mxu0 }
 0x188   :  { %v1658_v59 = vpop.f32.mrf.mxu0 }
 0x1a2   :  { %v1735_v2 = vpop.f32.mrf.mxu0 }
 0x1a3   :  { %v1694_v1 = vpop.f32.mrf.mxu1 }
 0x1a4   :  { %v1695_v4 = vadd.f32 %v1694_v1, %v1654_v0  ;;  %v1737_v8 = vpop.f32.mrf.mxu0 }
 0x1a5   :  { %v1696_v5 = vpop.f32.mrf.mxu1 }
 0x1a6   :  { %v1736_v9 = vadd.f32 %v1735_v2, %v1695_v4  ;;  %v1697_v10 = vadd.f32 %v1696_v5, %v1656_v3  ;;  %v1739_v12 = vpop.f32.mrf.mxu0 }
 0x1a7   :  { %v1698_v11 = vpop.f32.mrf.mxu1 }
 0x1a8   :  { %v1738_v13 = vadd.f32 %v1737_v8, %v1697_v10  ;;  %v1744_v14 = vmax.f32 %v1736_v9, 0.0  ;;  %v1740_v18 = vpop.f32.mrf.mxu0 }
 0x1a9   :  { %v1699_v17 = vpop.f32.mrf.mxu1 }
 0x1aa   :  { %v1745_v19 = vmax.f32 %v1738_v13, 0.0  ;;  %v1748_v21 = vpack.c.bf16 %v1744_v14, %v1744_v14 }
 0x1ac   :  { %v1749_v20 = vpack.c.bf16 %v1745_v19, %v1745_v19 }
 0x1ae   :  { %2078 = vmatprep.mubr.bf16.mxu1 %v1749_v20 }
 0x1af   :  { %2079 = vmatmul.mubr.bf16.vlgmr.msra.gmra.mxu1 %v1748_v21 }
 0x20e   :  { %v2380_v22 = vpop.f32.mrf.mxu0 }
 0x210   :  { %v2381_v23 = vpop.f32.mrf.mxu0 }
 0x211   :  { %v2382_v24 = vadd.f32 %v2381_v23, %v2380_v22 }
 0x212   :  { %v2383_v25 = vpop.f32.mrf.mxu0 }
 0x214   :  { %v2384_v26 = vpop.f32.mrf.mxu0 }
 0x26f   :  { %v2402_v27 = vpop.f32.mrf.mxu1 }
 0x271   :  { %v2403_v7 = vpop.f32.mrf.mxu1 }
 0x272   :  { %v2404_v51 = vadd.f32 %v2403_v7, %v2402_v27 }
 0x273   :  { %v2405_v28 = vpop.f32.mrf.mxu1 }
 0x274   :  { %v2081_v29 = vadd.f32 %v2404_v51, %v2382_v24 }
 0x275   :  { %v2406_v16 = vpop.f32.mrf.mxu1 }
 0x276   :  { %2086 = vst [vmem:[#allocation2] sm:$0xff] %v2081_v29 }
 0x277   :  { %2796 = shalt.err (!%p2793_p4)
}
 0x278   :  { %2096 = dma.vmem_to_hbm [thread:$0]  %s2094_s3, 128, %s3660_s4, [#allocation3]  }
 0x279   :  { %2805 = dma.done.wait [#allocation3], 128  }
 0x27a   :  { %2806 = vsyncadd [#allocation3], 4294967168 }
 0x27b   :  { %2100 = vsyncpa [#allocation3], 1 }

</bundles_post_ra>
